<compile_context>
chip_gen: v7x
topology: tpu7x:2x2x1
jax: 0.10.0
libtpu: 0.0.40
codegen_flags: <defaults>
</compile_context>

<pallas_src>
import functools

import jax
import jax.numpy as jnp
from jax.experimental import pallas as pl
from jax.experimental.pallas import tpu as pltpu

C1 = 0.01 ** 2
C2 = 0.03 ** 2


def _reflect_sum3(a, axis, first_mask, last_mask):
    """3-tap sum along `axis` with 1-pixel reflection at segment boundaries.

    `first_mask` / `last_mask` flag the first / last element of every
    reflection segment along `axis` (precomputed once, reused for all five
    pooled quantities).  Interior: a[i-1] + a[i] + a[i+1]; boundaries use the
    reflected value (first: a[i] + 2*a[i+1], last: a[i] + 2*a[i-1]), which also
    repairs the circular wrap / cross-segment pickup of the rolls.
    """
    n = a.shape[axis]
    prev = pltpu.roll(a, 1, axis)        # prev[i] = a[i-1]  (circular)
    nxt = pltpu.roll(a, n - 1, axis)     # nxt[i]  = a[i+1]  (circular)
    s = prev + a + nxt
    s = jnp.where(first_mask, a + 2.0 * nxt, s)
    s = jnp.where(last_mask, a + 2.0 * prev, s)
    return s


def _ssim_kernel(x_ref, y_ref, o_ref, *, img_h, img_w):
    """SSIM loss map on one block.

    The block is a stack of whole images: either (Bt, H, W) (direct layout) or
    (H, Bt*W) (batch folded into lanes).  Leading dims are collapsed into the
    row axis, and reflection is applied per period-`img_h` row segment and
    per period-`img_w` lane segment.
    """
    x = x_ref[...].astype(jnp.float32)
    y = y_ref[...].astype(jnp.float32)
    shape = x.shape
    lanes = shape[-1]

    x2 = x.reshape(-1, lanes)
    y2 = y.reshape(-1, lanes)
    rows = x2.shape[0]

    row_idx = jax.lax.broadcasted_iota(jnp.int32, x2.shape, 0)
    col_idx = jax.lax.broadcasted_iota(jnp.int32, x2.shape, 1)
    row_loc = row_idx if rows == img_h else row_idx % img_h
    col_loc = col_idx if lanes == img_w else col_idx % img_w
    row_first, row_last = row_loc == 0, row_loc == img_h - 1
    col_first, col_last = col_loc == 0, col_loc == img_w - 1

    inv9 = jnp.float32(1.0 / 9.0)

    def box(a):  # 3x3 reflection-padded average pool (separable, roll-based)
        a = _reflect_sum3(a, 0, row_first, row_last)   # vertical (sublanes)
        a = _reflect_sum3(a, 1, col_first, col_last)   # horizontal (lanes)
        return a * inv9

    mu_x = box(x2)
    mu_y = box(y2)
    sigma_x = box(x2 * x2) - mu_x * mu_x
    sigma_y = box(y2 * y2) - mu_y * mu_y
    sigma_xy = box(x2 * y2) - mu_x * mu_y

    ssim_n = (2.0 * mu_x * mu_y + C1) * (2.0 * sigma_xy + C2)
    ssim_d = (mu_x * mu_x + mu_y * mu_y + C1) * (sigma_x + sigma_y + C2)

    # Divide -> EUP reciprocal (free slot on the VPU-bound critical path).
    out = jnp.clip((1.0 - ssim_n * pl.reciprocal(ssim_d, approx=True)) * 0.5,
                   0.0, 1.0)
    o_ref[...] = out.reshape(shape).astype(o_ref.dtype)


def _vmem_capacity_bytes():
    try:
        return int(pltpu.get_tpu_info().vmem_capacity_bytes)
    except Exception:
        return 64 * 1024 * 1024   # conservative default (v7x per-TensorCore)


def _pick_block_images(batch, cap_images, lane_width=None):
    """Largest divisor of `batch` fitting the VMEM budget, preferring an even
    grid length (keeps both v7x TensorCores busy).  When `lane_width` is set
    (batch folded into lanes), the block's lane extent must be a multiple of
    128 unless the block spans the whole batch."""
    divs = []
    for d in range(1, batch + 1):
        if batch % d or d > cap_images:
            continue
        if lane_width is not None and d != batch and (d * lane_width) % 128:
            continue
        divs.append(d)
    if not divs:
        return None
    best = max(divs)
    even = [d for d in divs if (batch // d) % 2 == 0]
    if even and 2 * max(even) >= best:
        return max(even)
    return best


def ssim_pallas(x, y):
    """x, y: (N, C, H, W).  Returns clamp((1 - SSIM(x, y)) / 2, 0, 1),
    matching the PyTorch SSIM module."""
    assert x.shape == y.shape and x.ndim == 4
    N, C, H, W = x.shape
    assert H >= 2 and W >= 2, "reflection pad of 1 requires H, W >= 2"
    B = N * C

    itemsize = jnp.dtype(x.dtype).itemsize
    vmem_cap = _vmem_capacity_bytes()
    budget = int(vmem_cap * 0.55)
    # 2 inputs x 2 buffers + 1 output x 2 buffers, plus ~14 live f32 temps.
    per_image = H * W * (6 * itemsize + 14 * 4)
    cap_images = max(1, budget // per_image)
    vmem_limit = int(min(max(vmem_cap * 0.8, 32 * 1024 * 1024),
                         112 * 1024 * 1024))
    cparams = pltpu.CompilerParams(
        dimension_semantics=("parallel",),
        vmem_limit_bytes=vmem_limit,
    )
    kernel = functools.partial(_ssim_kernel, img_h=H, img_w=W)

    xb = x.reshape(B, H, W)
    yb = y.reshape(B, H, W)

    if W < 128:
        # Lane-dense path: fold the batch into the lane axis so each vreg's
        # 128 lanes do useful work and output stores are unmasked.
        bt = _pick_block_images(B, cap_images, lane_width=W)
        if bt is not None:
            xf = jnp.swapaxes(xb, 0, 1).reshape(H, B * W)
            yf = jnp.swapaxes(yb, 0, 1).reshape(H, B * W)
            spec = pl.BlockSpec((H, bt * W), lambda i: (0, i))
            out = pl.pallas_call(
                kernel,
                out_shape=jax.ShapeDtypeStruct((H, B * W), x.dtype),
                grid_spec=pltpu.PrefetchScalarGridSpec(
                    num_scalar_prefetch=0,
                    grid=(B // bt,),
                    in_specs=[spec, spec],
                    out_specs=spec,
                ),
                compiler_params=cparams,
            )(xf, yf)
            out = jnp.swapaxes(out.reshape(H, B, W), 0, 1)
            return out.reshape(N, C, H, W)

    # Direct path: blocks of whole images, lane axis = W (>= 128 here, or the
    # folded path found no feasible block).
    bt = _pick_block_images(B, cap_images)
    spec = pl.BlockSpec((bt, H, W), lambda i: (i, 0, 0))
    out = pl.pallas_call(
        kernel,
        out_shape=jax.ShapeDtypeStruct((B, H, W), x.dtype),
        grid_spec=pltpu.PrefetchScalarGridSpec(
            num_scalar_prefetch=0,
            grid=(B // bt,),
            in_specs=[spec, spec],
            out_specs=spec,
        ),
        compiler_params=cparams,
    )(xb, yb)
    return out.reshape(N, C, H, W)


def ssim_reference(x, y):
    """Pure-JAX reference mirroring the PyTorch module (for validation)."""
    H, W = x.shape[2], x.shape[3]
    xp = jnp.pad(x, ((0, 0), (0, 0), (1, 1), (1, 1)), mode="reflect").astype(jnp.float32)
    yp = jnp.pad(y, ((0, 0), (0, 0), (1, 1), (1, 1)), mode="reflect").astype(jnp.float32)

    def pool(a):
        acc = jnp.zeros(x.shape, jnp.float32)
        for dy in range(3):
            for dx in range(3):
                acc = acc + a[:, :, dy:dy + H, dx:dx + W]
        return acc / 9.0

    mu_x, mu_y = pool(xp), pool(yp)
    sigma_x = pool(xp * xp) - mu_x ** 2
    sigma_y = pool(yp * yp) - mu_y ** 2
    sigma_xy = pool(xp * yp) - mu_x * mu_y
    n = (2 * mu_x * mu_y + C1) * (2 * sigma_xy + C2)
    d = (mu_x ** 2 + mu_y ** 2 + C1) * (sigma_x + sigma_y + C2)
    return jnp.clip((1 - n / d) / 2, 0.0, 1.0).astype(x.dtype)


if __name__ == "__main__":
    key = jax.random.PRNGKey(0)
    k1, k2, k3, k4 = jax.random.split(key, 4)

    # Case 1: small W -> exercises the lane-folded (H, B*W) layout.
    x1 = jax.random.uniform(k1, (2, 4, 16, 16), dtype=jnp.float32)
    y1 = jax.random.uniform(k2, (2, 4, 16, 16), dtype=jnp.float32)
    o1 = jax.block_until_ready(ssim_pallas(x1, y1))
    r1 = jax.block_until_ready(ssim_reference(x1, y1))
    assert o1.shape == x1.shape
    # Tolerance accounts for the EUP approx reciprocal.
    assert jnp.allclose(o1, r1, atol=5e-3, rtol=5e-3), "folded-path mismatch"

    # Case 2: lane-aligned W -> exercises the direct (Bt, H, W) layout.
    x2 = jax.random.uniform(k3, (1, 2, 16, 128), dtype=jnp.float32)
    y2 = jax.random.uniform(k4, (1, 2, 16, 128), dtype=jnp.float32)
    o2 = jax.block_until_ready(ssim_pallas(x2, y2))
    r2 = jax.block_until_ready(ssim_reference(x2, y2))
    assert o2.shape == x2.shape
    assert jnp.allclose(o2, r2, atol=5e-3, rtol=5e-3), "direct-path mismatch"

    print("KERNEL_OK")
</pallas_src>

<mosaic_0001>
module attributes {stable_mosaic.version = 11 : i64} {
  func.func @_ssim_kernel(%arg0: i32, %arg1: memref<16x128xf32, #tpu.memory_space<vmem>>, %arg2: memref<16x128xf32, #tpu.memory_space<vmem>>, %arg3: memref<16x128xf32, #tpu.memory_space<vmem>>) attributes {dimension_semantics = [#tpu.dimension_semantics<parallel>], iteration_bounds = array<i64: 1>, scalar_prefetch = 0 : i64, scratch_operands = 0 : i64, tpu.core_type = #tpu.core_type<tc>, window_params = [{transform_indices = @transform_0, window_bounds = array<i64: 16, 128>}, {transform_indices = @transform_1, window_bounds = array<i64: 16, 128>}, {transform_indices = @transform_2, window_bounds = array<i64: 16, 128>}]} {
    %c0 = arith.constant 0 : index
    %c0_0 = arith.constant 0 : index
    %0 = vector.load %arg1[%c0, %c0_0] : memref<16x128xf32, #tpu.memory_space<vmem>>, vector<16x128xf32>
    %c0_1 = arith.constant 0 : index
    %c0_2 = arith.constant 0 : index
    %1 = vector.load %arg2[%c0_1, %c0_2] : memref<16x128xf32, #tpu.memory_space<vmem>>, vector<16x128xf32>
    %2 = tpu.iota {dimensions = array<i32: 0>} : vector<16x128xi32>
    %3 = tpu.iota {dimensions = array<i32: 1>} : vector<16x128xi32>
    %c16_i32 = arith.constant 16 : i32
    %c0_i32 = arith.constant 0 : i32
    %4 = arith.cmpi eq, %c16_i32, %c0_i32 : i32
    %c1_i32 = arith.constant 1 : i32
    %5 = arith.select %4, %c1_i32, %c16_i32 : i32
    %6 = vector.broadcast %5 : i32 to vector<16x128xi32>
    %7 = arith.remsi %3, %6 : vector<16x128xi32>
    %c0_i32_3 = arith.constant 0 : i32
    %8 = vector.broadcast %c0_i32_3 : i32 to vector<16x128xi32>
    %9 = arith.cmpi ne, %7, %8 : vector<16x128xi32>
    %c0_i32_4 = arith.constant 0 : i32
    %10 = vector.broadcast %c0_i32_4 : i32 to vector<16x128xi32>
    %11 = arith.cmpi slt, %7, %10 : vector<16x128xi32>
    %c0_i32_5 = arith.constant 0 : i32
    %12 = arith.cmpi slt, %5, %c0_i32_5 : i32
    %13 = vector.broadcast %12 : i1 to vector<16x128xi1>
    %14 = vector.broadcast %13 : vector<16x128xi1> to vector<16x128xi1>
    %15 = arith.xori %11, %14 : vector<16x128xi1>
    %16 = arith.andi %15, %9 : vector<16x128xi1>
    %17 = vector.broadcast %5 : i32 to vector<16x128xi32>
    %18 = arith.addi %7, %17 : vector<16x128xi32>
    %19 = arith.select %16, %18, %7 : vector<16x128xi1>, vector<16x128xi32>
    %c0_i32_6 = arith.constant 0 : i32
    %20 = vector.broadcast %c0_i32_6 : i32 to vector<16x128xi32>
    %21 = arith.cmpi eq, %2, %20 : vector<16x128xi32>
    %c15_i32 = arith.constant 15 : i32
    %22 = vector.broadcast %c15_i32 : i32 to vector<16x128xi32>
    %23 = arith.cmpi eq, %2, %22 : vector<16x128xi32>
    %c0_i32_7 = arith.constant 0 : i32
    %24 = vector.broadcast %c0_i32_7 : i32 to vector<16x128xi32>
    %25 = arith.cmpi eq, %19, %24 : vector<16x128xi32>
    %c15_i32_8 = arith.constant 15 : i32
    %26 = vector.broadcast %c15_i32_8 : i32 to vector<16x128xi32>
    %27 = arith.cmpi eq, %19, %26 : vector<16x128xi32>
    %c1_i32_9 = arith.constant 1 : i32
    %28 = tpu.dynamic_rotate %0 by %c1_i32_9 dim 0 : vector<16x128xf32>, i32 -> vector<16x128xf32>
    %c15_i32_10 = arith.constant 15 : i32
    %29 = tpu.dynamic_rotate %0 by %c15_i32_10 dim 0 : vector<16x128xf32>, i32 -> vector<16x128xf32>
    %30 = arith.addf %28, %0 : vector<16x128xf32>
    %31 = arith.addf %30, %29 : vector<16x128xf32>
    %cst = arith.constant 2.000000e+00 : f32
    %32 = vector.broadcast %cst : f32 to vector<16x128xf32>
    %33 = arith.mulf %32, %29 : vector<16x128xf32>
    %34 = arith.addf %0, %33 : vector<16x128xf32>
    %35 = arith.select %21, %34, %31 : vector<16x128xi1>, vector<16x128xf32>
    %cst_11 = arith.constant 2.000000e+00 : f32
    %36 = vector.broadcast %cst_11 : f32 to vector<16x128xf32>
    %37 = arith.mulf %36, %28 : vector<16x128xf32>
    %38 = arith.addf %0, %37 : vector<16x128xf32>
    %39 = arith.select %23, %38, %35 : vector<16x128xi1>, vector<16x128xf32>
    %c1_i32_12 = arith.constant 1 : i32
    %40 = tpu.dynamic_rotate %39 by %c1_i32_12 dim 1 : vector<16x128xf32>, i32 -> vector<16x128xf32>
    %c127_i32 = arith.constant 127 : i32
    %41 = tpu.dynamic_rotate %39 by %c127_i32 dim 1 : vector<16x128xf32>, i32 -> vector<16x128xf32>
    %42 = arith.addf %40, %39 : vector<16x128xf32>
    %43 = arith.addf %42, %41 : vector<16x128xf32>
    %cst_13 = arith.constant 2.000000e+00 : f32
    %44 = vector.broadcast %cst_13 : f32 to vector<16x128xf32>
    %45 = arith.mulf %44, %41 : vector<16x128xf32>
    %46 = arith.addf %39, %45 : vector<16x128xf32>
    %47 = arith.select %25, %46, %43 : vector<16x128xi1>, vector<16x128xf32>
    %cst_14 = arith.constant 2.000000e+00 : f32
    %48 = vector.broadcast %cst_14 : f32 to vector<16x128xf32>
    %49 = arith.mulf %48, %40 : vector<16x128xf32>
    %50 = arith.addf %39, %49 : vector<16x128xf32>
    %51 = arith.select %27, %50, %47 : vector<16x128xi1>, vector<16x128xf32>
    %cst_15 = arith.constant 0.111111112 : f32
    %52 = vector.broadcast %cst_15 : f32 to vector<16x128xf32>
    %53 = arith.mulf %51, %52 : vector<16x128xf32>
    %c1_i32_16 = arith.constant 1 : i32
    %54 = tpu.dynamic_rotate %1 by %c1_i32_16 dim 0 : vector<16x128xf32>, i32 -> vector<16x128xf32>
    %c15_i32_17 = arith.constant 15 : i32
    %55 = tpu.dynamic_rotate %1 by %c15_i32_17 dim 0 : vector<16x128xf32>, i32 -> vector<16x128xf32>
    %56 = arith.addf %54, %1 : vector<16x128xf32>
    %57 = arith.addf %56, %55 : vector<16x128xf32>
    %cst_18 = arith.constant 2.000000e+00 : f32
    %58 = vector.broadcast %cst_18 : f32 to vector<16x128xf32>
    %59 = arith.mulf %58, %55 : vector<16x128xf32>
    %60 = arith.addf %1, %59 : vector<16x128xf32>
    %61 = arith.select %21, %60, %57 : vector<16x128xi1>, vector<16x128xf32>
    %cst_19 = arith.constant 2.000000e+00 : f32
    %62 = vector.broadcast %cst_19 : f32 to vector<16x128xf32>
    %63 = arith.mulf %62, %54 : vector<16x128xf32>
    %64 = arith.addf %1, %63 : vector<16x128xf32>
    %65 = arith.select %23, %64, %61 : vector<16x128xi1>, vector<16x128xf32>
    %c1_i32_20 = arith.constant 1 : i32
    %66 = tpu.dynamic_rotate %65 by %c1_i32_20 dim 1 : vector<16x128xf32>, i32 -> vector<16x128xf32>
    %c127_i32_21 = arith.constant 127 : i32
    %67 = tpu.dynamic_rotate %65 by %c127_i32_21 dim 1 : vector<16x128xf32>, i32 -> vector<16x128xf32>
    %68 = arith.addf %66, %65 : vector<16x128xf32>
    %69 = arith.addf %68, %67 : vector<16x128xf32>
    %cst_22 = arith.constant 2.000000e+00 : f32
    %70 = vector.broadcast %cst_22 : f32 to vector<16x128xf32>
    %71 = arith.mulf %70, %67 : vector<16x128xf32>
    %72 = arith.addf %65, %71 : vector<16x128xf32>
    %73 = arith.select %25, %72, %69 : vector<16x128xi1>, vector<16x128xf32>
    %cst_23 = arith.constant 2.000000e+00 : f32
    %74 = vector.broadcast %cst_23 : f32 to vector<16x128xf32>
    %75 = arith.mulf %74, %66 : vector<16x128xf32>
    %76 = arith.addf %65, %75 : vector<16x128xf32>
    %77 = arith.select %27, %76, %73 : vector<16x128xi1>, vector<16x128xf32>
    %cst_24 = arith.constant 0.111111112 : f32
    %78 = vector.broadcast %cst_24 : f32 to vector<16x128xf32>
    %79 = arith.mulf %77, %78 : vector<16x128xf32>
    %80 = arith.mulf %0, %0 : vector<16x128xf32>
    %c1_i32_25 = arith.constant 1 : i32
    %81 = tpu.dynamic_rotate %80 by %c1_i32_25 dim 0 : vector<16x128xf32>, i32 -> vector<16x128xf32>
    %c15_i32_26 = arith.constant 15 : i32
    %82 = tpu.dynamic_rotate %80 by %c15_i32_26 dim 0 : vector<16x128xf32>, i32 -> vector<16x128xf32>
    %83 = arith.addf %81, %80 : vector<16x128xf32>
    %84 = arith.addf %83, %82 : vector<16x128xf32>
    %cst_27 = arith.constant 2.000000e+00 : f32
    %85 = vector.broadcast %cst_27 : f32 to vector<16x128xf32>
    %86 = arith.mulf %85, %82 : vector<16x128xf32>
    %87 = arith.addf %80, %86 : vector<16x128xf32>
    %88 = arith.select %21, %87, %84 : vector<16x128xi1>, vector<16x128xf32>
    %cst_28 = arith.constant 2.000000e+00 : f32
    %89 = vector.broadcast %cst_28 : f32 to vector<16x128xf32>
    %90 = arith.mulf %89, %81 : vector<16x128xf32>
    %91 = arith.addf %80, %90 : vector<16x128xf32>
    %92 = arith.select %23, %91, %88 : vector<16x128xi1>, vector<16x128xf32>
    %c1_i32_29 = arith.constant 1 : i32
    %93 = tpu.dynamic_rotate %92 by %c1_i32_29 dim 1 : vector<16x128xf32>, i32 -> vector<16x128xf32>
    %c127_i32_30 = arith.constant 127 : i32
    %94 = tpu.dynamic_rotate %92 by %c127_i32_30 dim 1 : vector<16x128xf32>, i32 -> vector<16x128xf32>
    %95 = arith.addf %93, %92 : vector<16x128xf32>
    %96 = arith.addf %95, %94 : vector<16x128xf32>
    %cst_31 = arith.constant 2.000000e+00 : f32
    %97 = vector.broadcast %cst_31 : f32 to vector<16x128xf32>
    %98 = arith.mulf %97, %94 : vector<16x128xf32>
    %99 = arith.addf %92, %98 : vector<16x128xf32>
    %100 = arith.select %25, %99, %96 : vector<16x128xi1>, vector<16x128xf32>
    %cst_32 = arith.constant 2.000000e+00 : f32
    %101 = vector.broadcast %cst_32 : f32 to vector<16x128xf32>
    %102 = arith.mulf %101, %93 : vector<16x128xf32>
    %103 = arith.addf %92, %102 : vector<16x128xf32>
    %104 = arith.select %27, %103, %100 : vector<16x128xi1>, vector<16x128xf32>
    %cst_33 = arith.constant 0.111111112 : f32
    %105 = vector.broadcast %cst_33 : f32 to vector<16x128xf32>
    %106 = arith.mulf %104, %105 : vector<16x128xf32>
    %107 = arith.mulf %53, %53 : vector<16x128xf32>
    %108 = arith.subf %106, %107 : vector<16x128xf32>
    %109 = arith.mulf %1, %1 : vector<16x128xf32>
    %c1_i32_34 = arith.constant 1 : i32
    %110 = tpu.dynamic_rotate %109 by %c1_i32_34 dim 0 : vector<16x128xf32>, i32 -> vector<16x128xf32>
    %c15_i32_35 = arith.constant 15 : i32
    %111 = tpu.dynamic_rotate %109 by %c15_i32_35 dim 0 : vector<16x128xf32>, i32 -> vector<16x128xf32>
    %112 = arith.addf %110, %109 : vector<16x128xf32>
    %113 = arith.addf %112, %111 : vector<16x128xf32>
    %cst_36 = arith.constant 2.000000e+00 : f32
    %114 = vector.broadcast %cst_36 : f32 to vector<16x128xf32>
    %115 = arith.mulf %114, %111 : vector<16x128xf32>
    %116 = arith.addf %109, %115 : vector<16x128xf32>
    %117 = arith.select %21, %116, %113 : vector<16x128xi1>, vector<16x128xf32>
    %cst_37 = arith.constant 2.000000e+00 : f32
    %118 = vector.broadcast %cst_37 : f32 to vector<16x128xf32>
    %119 = arith.mulf %118, %110 : vector<16x128xf32>
    %120 = arith.addf %109, %119 : vector<16x128xf32>
    %121 = arith.select %23, %120, %117 : vector<16x128xi1>, vector<16x128xf32>
    %c1_i32_38 = arith.constant 1 : i32
    %122 = tpu.dynamic_rotate %121 by %c1_i32_38 dim 1 : vector<16x128xf32>, i32 -> vector<16x128xf32>
    %c127_i32_39 = arith.constant 127 : i32
    %123 = tpu.dynamic_rotate %121 by %c127_i32_39 dim 1 : vector<16x128xf32>, i32 -> vector<16x128xf32>
    %124 = arith.addf %122, %121 : vector<16x128xf32>
    %125 = arith.addf %124, %123 : vector<16x128xf32>
    %cst_40 = arith.constant 2.000000e+00 : f32
    %126 = vector.broadcast %cst_40 : f32 to vector<16x128xf32>
    %127 = arith.mulf %126, %123 : vector<16x128xf32>
    %128 = arith.addf %121, %127 : vector<16x128xf32>
    %129 = arith.select %25, %128, %125 : vector<16x128xi1>, vector<16x128xf32>
    %cst_41 = arith.constant 2.000000e+00 : f32
    %130 = vector.broadcast %cst_41 : f32 to vector<16x128xf32>
    %131 = arith.mulf %130, %122 : vector<16x128xf32>
    %132 = arith.addf %121, %131 : vector<16x128xf32>
    %133 = arith.select %27, %132, %129 : vector<16x128xi1>, vector<16x128xf32>
    %cst_42 = arith.constant 0.111111112 : f32
    %134 = vector.broadcast %cst_42 : f32 to vector<16x128xf32>
    %135 = arith.mulf %133, %134 : vector<16x128xf32>
    %136 = arith.mulf %79, %79 : vector<16x128xf32>
    %137 = arith.subf %135, %136 : vector<16x128xf32>
    %138 = arith.mulf %0, %1 : vector<16x128xf32>
    %c1_i32_43 = arith.constant 1 : i32
    %139 = tpu.dynamic_rotate %138 by %c1_i32_43 dim 0 : vector<16x128xf32>, i32 -> vector<16x128xf32>
    %c15_i32_44 = arith.constant 15 : i32
    %140 = tpu.dynamic_rotate %138 by %c15_i32_44 dim 0 : vector<16x128xf32>, i32 -> vector<16x128xf32>
    %141 = arith.addf %139, %138 : vector<16x128xf32>
    %142 = arith.addf %141, %140 : vector<16x128xf32>
    %cst_45 = arith.constant 2.000000e+00 : f32
    %143 = vector.broadcast %cst_45 : f32 to vector<16x128xf32>
    %144 = arith.mulf %143, %140 : vector<16x128xf32>
    %145 = arith.addf %138, %144 : vector<16x128xf32>
    %146 = arith.select %21, %145, %142 : vector<16x128xi1>, vector<16x128xf32>
    %cst_46 = arith.constant 2.000000e+00 : f32
    %147 = vector.broadcast %cst_46 : f32 to vector<16x128xf32>
    %148 = arith.mulf %147, %139 : vector<16x128xf32>
    %149 = arith.addf %138, %148 : vector<16x128xf32>
    %150 = arith.select %23, %149, %146 : vector<16x128xi1>, vector<16x128xf32>
    %c1_i32_47 = arith.constant 1 : i32
    %151 = tpu.dynamic_rotate %150 by %c1_i32_47 dim 1 : vector<16x128xf32>, i32 -> vector<16x128xf32>
    %c127_i32_48 = arith.constant 127 : i32
    %152 = tpu.dynamic_rotate %150 by %c127_i32_48 dim 1 : vector<16x128xf32>, i32 -> vector<16x128xf32>
    %153 = arith.addf %151, %150 : vector<16x128xf32>
    %154 = arith.addf %153, %152 : vector<16x128xf32>
    %cst_49 = arith.constant 2.000000e+00 : f32
    %155 = vector.broadcast %cst_49 : f32 to vector<16x128xf32>
    %156 = arith.mulf %155, %152 : vector<16x128xf32>
    %157 = arith.addf %150, %156 : vector<16x128xf32>
    %158 = arith.select %25, %157, %154 : vector<16x128xi1>, vector<16x128xf32>
    %cst_50 = arith.constant 2.000000e+00 : f32
    %159 = vector.broadcast %cst_50 : f32 to vector<16x128xf32>
    %160 = arith.mulf %159, %151 : vector<16x128xf32>
    %161 = arith.addf %150, %160 : vector<16x128xf32>
    %162 = arith.select %27, %161, %158 : vector<16x128xi1>, vector<16x128xf32>
    %cst_51 = arith.constant 0.111111112 : f32
    %163 = vector.broadcast %cst_51 : f32 to vector<16x128xf32>
    %164 = arith.mulf %162, %163 : vector<16x128xf32>
    %165 = arith.mulf %53, %79 : vector<16x128xf32>
    %166 = arith.subf %164, %165 : vector<16x128xf32>
    %cst_52 = arith.constant 2.000000e+00 : f32
    %167 = vector.broadcast %cst_52 : f32 to vector<16x128xf32>
    %168 = arith.mulf %167, %53 : vector<16x128xf32>
    %169 = arith.mulf %168, %79 : vector<16x128xf32>
    %cst_53 = arith.constant 9.99999974E-5 : f32
    %170 = vector.broadcast %cst_53 : f32 to vector<16x128xf32>
    %171 = arith.addf %169, %170 : vector<16x128xf32>
    %cst_54 = arith.constant 2.000000e+00 : f32
    %172 = vector.broadcast %cst_54 : f32 to vector<16x128xf32>
    %173 = arith.mulf %172, %166 : vector<16x128xf32>
    %cst_55 = arith.constant 8.99999984E-4 : f32
    %174 = vector.broadcast %cst_55 : f32 to vector<16x128xf32>
    %175 = arith.addf %173, %174 : vector<16x128xf32>
    %176 = arith.mulf %171, %175 : vector<16x128xf32>
    %177 = arith.mulf %53, %53 : vector<16x128xf32>
    %178 = arith.mulf %79, %79 : vector<16x128xf32>
    %179 = arith.addf %177, %178 : vector<16x128xf32>
    %cst_56 = arith.constant 9.99999974E-5 : f32
    %180 = vector.broadcast %cst_56 : f32 to vector<16x128xf32>
    %181 = arith.addf %179, %180 : vector<16x128xf32>
    %182 = arith.addf %108, %137 : vector<16x128xf32>
    %cst_57 = arith.constant 8.99999984E-4 : f32
    %183 = vector.broadcast %cst_57 : f32 to vector<16x128xf32>
    %184 = arith.addf %182, %183 : vector<16x128xf32>
    %185 = arith.mulf %181, %184 : vector<16x128xf32>
    %186 = tpu.reciprocal %185 {approx = true} : vector<16x128xf32> -> vector<16x128xf32>
    %187 = arith.mulf %176, %186 : vector<16x128xf32>
    %cst_58 = arith.constant 1.000000e+00 : f32
    %188 = vector.broadcast %cst_58 : f32 to vector<16x128xf32>
    %189 = arith.subf %188, %187 : vector<16x128xf32>
    %cst_59 = arith.constant 5.000000e-01 : f32
    %190 = vector.broadcast %cst_59 : f32 to vector<16x128xf32>
    %191 = arith.mulf %189, %190 : vector<16x128xf32>
    %cst_60 = arith.constant 0.000000e+00 : f32
    %cst_61 = arith.constant 1.000000e+00 : f32
    %192 = vector.broadcast %cst_60 : f32 to vector<16x128xf32>
    %193 = arith.maximumf %192, %191 : vector<16x128xf32>
    %194 = vector.broadcast %cst_61 : f32 to vector<16x128xf32>
    %195 = arith.minimumf %194, %193 : vector<16x128xf32>
    %c0_62 = arith.constant 0 : index
    %c0_63 = arith.constant 0 : index
    %196 = vector.load %arg3[%c0_62, %c0_63] : memref<16x128xf32, #tpu.memory_space<vmem>>, vector<16x128xf32>
    tpu.vector_store %arg3[%c0_62, %c0_63], %195 {strides = array<i32>} : memref<16x128xf32, #tpu.memory_space<vmem>>, vector<16x128xf32>,
    return
  }
  func.func @transform_0(%arg0: i32) -> (i32, i32) {
    %c0_i32 = arith.constant 0 : i32
    %c0_i32_0 = arith.constant 0 : i32
    return %c0_i32, %arg0 : i32, i32
  }
  func.func @transform_1(%arg0: i32) -> (i32, i32) {
    %c0_i32 = arith.constant 0 : i32
    %c0_i32_0 = arith.constant 0 : i32
    return %c0_i32, %arg0 : i32, i32
  }
  func.func @transform_2(%arg0: i32) -> (i32, i32) {
    %c0_i32 = arith.constant 0 : i32
    %c0_i32_0 = arith.constant 0 : i32
    return %c0_i32, %arg0 : i32, i32
  }
}

</mosaic_0001>

<bundles_post_ra>
// kernel: tpu_custom_call.1
= control target key start
LH: loop header
LB: loop body
LE: loop exit
PB: predicated region body
PF: predicated region fallthrough
CT: control target
= control target key end

     0   :  { %7 = vsyncpa [#allocation3], 0  ;;  %s810_s0 = inlined_call_operand.hbm [shape: f32[16,128], index: 0, kind: input, shape index: {}]   ;;  %s811_s1 = inlined_call_operand.hbm [shape: f32[16,128], index: 1, kind: input, shape index: {}]   ;;  %s812_s2 = inlined_call_operand.hbm [shape: f32[16,128], index: 2, kind: output, shape index: {}]  }
   0x1   :  { %8 = vsyncpa [#allocation6], 0 }
   0x2   :  { %9 = vsyncpa [#allocation4], 0  ;;  %s474_s9 = smov [#allocation2]   ;;  %s402_s13 = scalar_lea.hbm %s810_s0, 256 }
   0x3   :  { %s15_s10 = sshll.u32 %s474_s9, 4  ;;  %p403_p0 = scmp.ne.s32.totalorder %s810_s0, %s402_s13  ;;  %s16_s10 = int_to_ptr.vmem [resolvable:$true] %s15_s10 }
   0x4   :  { %p406_p1 = scmp.lt.u32.totalorder %s402_s13, %s810_s0 }
   0x6   :  { %p408_p2 = pnand %p406_p1, %p403_p0 }
   0x8   :  { %411 = shalt.err (!%p408_p2)
}
   0x9   :  { %s412_s18 = scalar_lea.vmem %s16_s10, 256  ;;  %p417_p4 = scmp.lt.s32.totalorder %s16_s10, %s16_s10 }
   0xa   :  { %p413_p3 = scmp.ne.s32.totalorder %s16_s10, %s412_s18  ;;  %p418_p5 = scmp.lt.s32.totalorder %s412_s18, %s412_s18 }
   0xc   :  { %p419_p6 = por %p418_p5, %p417_p4 }
   0xe   :  { %p420_p7 = pnand %p419_p6, %p413_p3 }
  0x10   :  { %423 = shalt.err (!%p420_p7)
}
  0x11   :  { %s475_s19 = smov 128   ;;  %s476_s20 = smov 8  }
  0x12   :  { %21 = dma.hbm_to_vmem [thread:$0]  %s810_s0, 256, %s16_s10, [#allocation3], %s475_s19, %s475_s19, %s476_s20  }
  0x13   :  { %s477_s23 = smov [#allocation5]   ;;  %s424_s27 = scalar_lea.hbm %s811_s1, 256 }
  0x14   :  { %s27_s24 = sshll.u32 %s477_s23, 4  ;;  %p425_p8 = scmp.ne.s32.totalorder %s811_s1, %s424_s27  ;;  %s28_s24 = int_to_ptr.vmem [resolvable:$true] %s27_s24 }
  0x15   :  { %p428_p9 = scmp.lt.u32.totalorder %s424_s27, %s811_s1 }
  0x17   :  { %p430_p10 = pnand %p428_p9, %p425_p8 }
  0x19   :  { %433 = shalt.err (!%p430_p10)
}
  0x1a   :  { %s434_s4 = scalar_lea.vmem %s28_s24, 256  ;;  %p439_p12 = scmp.lt.s32.totalorder %s28_s24, %s28_s24 }
  0x1b   :  { %p435_p11 = scmp.ne.s32.totalorder %s28_s24, %s434_s4  ;;  %p440_p13 = scmp.lt.s32.totalorder %s434_s4, %s434_s4 }
  0x1d   :  { %p441_p0 = por %p440_p13, %p439_p12 }
  0x1f   :  { %p442_p1 = pnand %p441_p0, %p435_p11 }
  0x21   :  { %445 = shalt.err (!%p442_p1)
}
  0x22   :  { %33 = dma.hbm_to_vmem [thread:$0]  %s811_s1, 256, %s28_s24, [#allocation6], %s475_s19, %s475_s19, %s476_s20  }
  0x23   :  { %468 = dma.done.wait [#allocation3], 256  }
  0x24   :  { %469 = vsyncadd [#allocation3], 4294967040 }
  0x25   :  { %470 = dma.done.wait [#allocation6], 256  }
  0x26   :  { %471 = vsyncadd [#allocation6], 4294967040  ;;  %v44_v0 = vlaneseq  ;;  %v533_v3 = vld [vmem:[#allocation2] sm:$0xff]  ;;  %v535_v4 = vld [vmem:[#allocation2 + $0x8] sm:$0xff]  ;;  %s478_s1 = smov 127   ;;  %s479_s6 = smov 1  }
  0x27   :  { %v540_v5 = vld [vmem:[#allocation5] sm:$0xff]  ;;  %v67_v6 = vrot.slane %v533_v3, 7  ;;  %v68_v7 = vrot.slane %v535_v4, 7  ;;  %v72_v8 = vrot.slane %v533_v3, 1  ;;  %v73_v9 = vrot.slane %v535_v4, 1  ;;  %v546_v10 = vld [vmem:[#allocation5 + $0x8] sm:$0xff] }
  0x28   :  { %v527_v1 = vshrl.u32 %v44_v0, 7  ;;  %v119_v11 = vrot.slane %v540_v5, 7  ;;  %v120_v12 = vrot.slane %v546_v10, 7  ;;  %v123_v13 = vrot.slane %v540_v5, 1  ;;  %s480_s7 = smov [#allocation7]  }
  0x29   :  { %v124_v14 = vrot.slane %v546_v10, 1  ;;  %v169_v37 = vmul.f32 %v533_v3, %v533_v3  ;;  %v170_v38 = vmul.f32 %v535_v4, %v535_v4  ;;  %v225_v47 = vmul.f32 %v540_v5, %v540_v5  ;;  %s378_s8 = sshll.u32 %s480_s7, 4  ;;  %s379_s8 = int_to_ptr.vmem [resolvable:$true] %s378_s8 }
  0x2a   :  { %v530_v2 = vadd.s32 8, %v527_v1  ;;  %vm61_vm0 = vcmp.eq.s32.totalorder %v527_v1, 0  ;;  %vm69_vm1 = vcmp.lt.s32.totalorder %v527_v1, 1  ;;  %vm74_vm2 = vcmp.lt.s32.totalorder %v527_v1, 7  ;;  %s446_s9 = scalar_lea.vmem %s379_s8, 256  ;;  %p451_p3 = scmp.lt.s32.totalorder %s379_s8, %s379_s8 }
  0x2b   :  { %v71_v15 = vsel %vm69_vm1, %v68_v7, %v67_v6  ;;  %v75_v16 = vsel %vm74_vm2, %v72_v8, %v73_v9  ;;  %v70_v17 = vsel %vm69_vm1, %v67_v6, %v68_v7  ;;  %v76_v18 = vsel %vm74_vm2, %v73_v9, %v72_v8  ;;  %p447_p2 = scmp.ne.s32.totalorder %s379_s8, %s446_s9  ;;  %p452_p4 = scmp.lt.s32.totalorder %s446_s9, %s446_s9 }
  0x2c   :  { %vm64_vm3 = vcmp.eq.s32.totalorder %v530_v2, 15  ;;  %v77_v19 = vadd.f32 %v71_v15, %v533_v3  ;;  %v81_v20 = vmul.f32 2.0, %v75_v16  ;;  %v78_v21 = vadd.f32 %v70_v17, %v535_v4 }
  0x2d   :  { %v88_v22 = vmul.f32 2.0, %v70_v17  ;;  %v121_v23 = vsel %vm69_vm1, %v119_v11, %v120_v12  ;;  %v126_v24 = vsel %vm74_vm2, %v124_v14, %v123_v13  ;;  %v122_v25 = vsel %vm69_vm1, %v120_v12, %v119_v11  ;;  %p453_p5 = por %p452_p4, %p451_p3 }
  0x2e   :  { %v125_v26 = vsel %vm74_vm2, %v123_v13, %v124_v14  ;;  %v79_v27 = vadd.f32 %v77_v19, %v75_v16  ;;  %v83_v28 = vadd.f32 %v81_v20, %v533_v3  ;;  %v80_v29 = vadd.f32 %v78_v21, %v76_v18 }
  0x2f   :  { %v90_v30 = vadd.f32 %v88_v22, %v535_v4  ;;  %v128_v31 = vadd.f32 %v121_v23, %v546_v10  ;;  %v138_v32 = vmul.f32 2.0, %v121_v23  ;;  %v127_v33 = vadd.f32 %v122_v25, %v540_v5  ;;  %p454_p6 = pnand %p453_p5, %p447_p2 }
  0x30   :  { %v131_v34 = vmul.f32 2.0, %v125_v26  ;;  %v576_v35 = vsel %vm61_vm0, %v83_v28, %v79_v27  ;;  %v171_v43 = vrot.slane %v169_v37, 7  ;;  %v172_v44 = vrot.slane %v170_v38, 7 }
  0x31   :  { %v580_v36 = vsel %vm64_vm3, %v90_v30, %v80_v29  ;;  %97 = vrot.lane.b32.xlu1 %v576_v35, %s478_s1  ;;  %93 = vrot.lane.b32.xlu0 %v576_v35, %s479_s6  ;;  %v130_v39 = vadd.f32 %v128_v31, %v126_v24  ;;  %v140_v40 = vadd.f32 %v138_v32, %v546_v10  ;;  %v175_v45 = vrot.slane %v169_v37, 1 }
  0x32   :  { %v129_v41 = vadd.f32 %v127_v33, %v125_v26  ;;  %v133_v42 = vadd.f32 %v131_v34, %v540_v5  ;;  %v176_v46 = vrot.slane %v170_v38, 1  ;;  %v226_v48 = vmul.f32 %v546_v10, %v546_v10 }
  0x33   :  { %v598_v49 = vsel %vm64_vm3, %v140_v40, %v130_v39  ;;  %v173_v51 = vsel %vm69_vm1, %v171_v43, %v172_v44  ;;  %v174_v52 = vsel %vm69_vm1, %v172_v44, %v171_v43  ;;  %v227_v59 = vrot.slane %v225_v47, 7 }
  0x34   :  { %v602_v50 = vsel %vm61_vm0, %v133_v42, %v129_v41  ;;  %v178_v53 = vsel %vm74_vm2, %v176_v46, %v175_v45  ;;  %v180_v54 = vadd.f32 %v173_v51, %v170_v38  ;;  %v190_v55 = vmul.f32 2.0, %v173_v51 }
  0x35   :  { %99 = vrot.lane.b32.xlu1 %v580_v36, %s478_s1  ;;  %95 = vrot.lane.b32.xlu0 %v580_v36, %s479_s6  ;;  %v177_v56 = vsel %vm74_vm2, %v175_v45, %v176_v46  ;;  %v179_v57 = vadd.f32 %v174_v52, %v169_v37  ;;  %v228_v60 = vrot.slane %v226_v48, 7  ;;  %v231_v61 = vrot.slane %v225_v47, 1 }
  0x36   :  { %v183_v58 = vmul.f32 2.0, %v177_v56  ;;  %v232_v62 = vrot.slane %v226_v48, 1  ;;  %v182_v63 = vadd.f32 %v180_v54, %v178_v53  ;;  %v192_v6 = vadd.f32 %v190_v55, %v170_v38 }
  0x37   :  { %v229_v7 = vsel %vm69_vm1, %v227_v59, %v228_v60  ;;  %v181_v8 = vadd.f32 %v179_v57, %v177_v56  ;;  %v230_v11 = vsel %vm69_vm1, %v228_v60, %v227_v59  ;;  %v281_v13 = vmul.f32 %v540_v5, %v533_v3 }
  0x38   :  { %v185_v9 = vadd.f32 %v183_v58, %v169_v37  ;;  %v233_v12 = vsel %vm74_vm2, %v231_v61, %v232_v62  ;;  %v282_v14 = vmul.f32 %v546_v10, %v535_v4  ;;  %v236_v15 = vadd.f32 %v229_v7, %v226_v48 }
  0x39   :  { %145 = vrot.lane.b32.xlu1 %v598_v49, %s479_s6  ;;  %143 = vrot.lane.b32.xlu0 %v602_v50, %s479_s6  ;;  %v234_v16 = vsel %vm74_vm2, %v232_v62, %v231_v61  ;;  %v246_v17 = vmul.f32 2.0, %v229_v7  ;;  %v235_v18 = vadd.f32 %v230_v11, %v225_v47  ;;  %v239_v19 = vmul.f32 2.0, %v233_v12 }
  0x3a   :  { %v638_v20 = vsel %vm64_vm3, %v192_v6, %v182_v63  ;;  %v642_v3 = vsel %vm61_vm0, %v185_v9, %v181_v8  ;;  %v283_v4 = vrot.slane %v281_v13, 7  ;;  %v284_v5 = vrot.slane %v282_v14, 7 }
  0x3b   :  { %v287_v10 = vrot.slane %v281_v13, 1  ;;  %v288_v21 = vrot.slane %v282_v14, 1  ;;  %v238_v22 = vadd.f32 %v236_v15, %v234_v16  ;;  %v248_v23 = vadd.f32 %v246_v17, %v226_v48 }
  0x3c   :  { %v237_v24 = vadd.f32 %v235_v18, %v233_v12  ;;  %v241_v25 = vadd.f32 %v239_v19, %v225_v47  ;;  %v285_v26 = vsel %vm69_vm1, %v283_v4, %v284_v5  ;;  %v286_v27 = vsel %vm69_vm1, %v284_v5, %v283_v4 }
  0x3d   :  { %149 = vrot.lane.b32.xlu1 %v598_v49, %s478_s1  ;;  %147 = vrot.lane.b32.xlu0 %v602_v50, %s478_s1  ;;  %v289_v28 = vsel %vm74_vm2, %v287_v10, %v288_v21  ;;  %v660_v29 = vsel %vm64_vm3, %v248_v23, %v238_v22  ;;  %v292_v31 = vadd.f32 %v285_v26, %v282_v14  ;;  %v302_v32 = vmul.f32 2.0, %v285_v26 }
  0x3e   :  { %v664_v30 = vsel %vm61_vm0, %v241_v25, %v237_v24  ;;  %v291_v33 = vadd.f32 %v286_v27, %v281_v13  ;;  %v295_v34 = vmul.f32 2.0, %v289_v28  ;;  %v290_v37 = vsel %vm74_vm2, %v288_v21, %v287_v10 }
  0x3f   :  { %v294_v38 = vadd.f32 %v292_v31, %v290_v37  ;;  %v304_v39 = vadd.f32 %v302_v32, %v282_v14  ;;  %v48_v1 = vand.u32 127, %v44_v0 }
  0x40   :  { %v293_v40 = vadd.f32 %v291_v33, %v289_v28  ;;  %v297_v41 = vadd.f32 %v295_v34, %v281_v13 }
  0x41   :  { %197 = vrot.lane.b32.xlu1 %v638_v20, %s479_s6  ;;  %195 = vrot.lane.b32.xlu0 %v642_v3, %s479_s6  ;;  %v678_v42 = vsel %vm64_vm3, %v304_v39, %v294_v38  ;;  %v53_v53 = vand.u32 15, %v48_v1 }
  0x42   :  { %v682_v43 = vsel %vm61_vm0, %v297_v41, %v293_v40 }
  0x43   :  { %vm696_vm4 = vcmp.eq.s32.totalorder %v53_v53, 0  ;;  %vm706_vm5 = vcmp.eq.s32.totalorder %v53_v53, 15 }
  0x45   :  { %201 = vrot.lane.b32.xlu1 %v638_v20, %s478_s1  ;;  %199 = vrot.lane.b32.xlu0 %v642_v3, %s478_s1 }
  0x49   :  { %253 = vrot.lane.b32.xlu1 %v660_v29, %s479_s6  ;;  %251 = vrot.lane.b32.xlu0 %v664_v30, %s479_s6 }
  0x4d   :  { %257 = vrot.lane.b32.xlu1 %v660_v29, %s478_s1  ;;  %255 = vrot.lane.b32.xlu0 %v664_v30, %s478_s1 }
  0x51   :  { %309 = vrot.lane.b32.xlu1 %v678_v42, %s479_s6  ;;  %307 = vrot.lane.b32.xlu0 %v682_v43, %s479_s6 }
  0x55   :  { %313 = vrot.lane.b32.xlu1 %v678_v42, %s478_s1  ;;  %311 = vrot.lane.b32.xlu0 %v682_v43, %s478_s1 }
  0xa3   :  { %v98_v44 = vpop.permute.xlu1 %97  ;;  %v94_v2 = vpop.permute.xlu0 %93 }
  0xa4   :  { %v105_v51 = vmul.f32 2.0, %v98_v44  ;;  %v101_v52 = vadd.f32 %v94_v2, %v576_v35  ;;  %v111_v56 = vmul.f32 2.0, %v94_v2 }
  0xa6   :  { %v107_v61 = vadd.f32 %v105_v51, %v576_v35  ;;  %v103_v62 = vadd.f32 %v101_v52, %v98_v44  ;;  %v113_v11 = vadd.f32 %v111_v56, %v576_v35 }
  0xa7   :  { %v100_v45 = vpop.permute.xlu1 %99  ;;  %v96_v46 = vpop.permute.xlu0 %95 }
  0xa8   :  { %v106_v58 = vmul.f32 2.0, %v100_v45  ;;  %v102_v59 = vadd.f32 %v96_v46, %v580_v36  ;;  %v112_v0 = vmul.f32 2.0, %v96_v46  ;;  %v109_v4 = vsel %vm696_vm4, %v107_v61, %v103_v62 }
  0xa9   :  { %v115_v27 = vsel %vm706_vm5, %v113_v11, %v109_v4 }
  0xaa   :  { %v108_v15 = vadd.f32 %v106_v58, %v580_v36  ;;  %v104_v16 = vadd.f32 %v102_v59, %v100_v45  ;;  %v114_v35 = vadd.f32 %v112_v0, %v580_v36  ;;  %v733_v2 = vmul.f32 0.11111111, %v115_v27 }
  0xab   :  { %v146_v47 = vpop.permute.xlu1 %145  ;;  %v144_v48 = vpop.permute.xlu0 %143 }
  0xac   :  { %v152_v6 = vadd.f32 %v146_v47, %v598_v49  ;;  %v162_v12 = vmul.f32 2.0, %v146_v47  ;;  %v151_v13 = vadd.f32 %v144_v48, %v602_v50  ;;  %v161_v17 = vmul.f32 2.0, %v144_v48 }
  0xad   :  { %v110_v28 = vsel %vm696_vm4, %v108_v15, %v104_v16 }
  0xae   :  { %v164_v23 = vadd.f32 %v162_v12, %v598_v49  ;;  %v163_v36 = vadd.f32 %v161_v17, %v602_v50 }
  0xaf   :  { %v150_v54 = vpop.permute.xlu1 %149  ;;  %v148_v55 = vpop.permute.xlu0 %147 }
  0xb0   :  { %v156_v57 = vmul.f32 2.0, %v150_v54  ;;  %v155_v60 = vmul.f32 2.0, %v148_v55  ;;  %v154_v18 = vadd.f32 %v152_v6, %v150_v54  ;;  %v153_v5 = vadd.f32 %v151_v13, %v148_v55 }
  0xb2   :  { %v158_v7 = vadd.f32 %v156_v57, %v598_v49  ;;  %v157_v14 = vadd.f32 %v155_v60, %v602_v50  ;;  %v116_v50 = vsel %vm706_vm5, %v114_v35, %v110_v28 }
  0xb3   :  { %v198_v8 = vpop.permute.xlu1 %197  ;;  %v196_v9 = vpop.permute.xlu0 %195  ;;  %v742_v51 = vmul.f32 0.11111111, %v116_v50 }
  0xb4   :  { %v160_v10 = vsel %vm696_vm4, %v158_v7, %v154_v18  ;;  %v159_v24 = vsel %vm696_vm4, %v157_v14, %v153_v5  ;;  %v204_v31 = vadd.f32 %v198_v8, %v638_v20  ;;  %v214_v33 = vmul.f32 2.0, %v198_v8 }
  0xb5   :  { %v166_v32 = vsel %vm706_vm5, %v164_v23, %v160_v10  ;;  %v203_v49 = vadd.f32 %v196_v9, %v642_v3  ;;  %v165_v37 = vsel %vm706_vm5, %v163_v36, %v159_v24  ;;  %v213_v38 = vmul.f32 2.0, %v196_v9 }
  0xb6   :  { %v735_v45 = vmul.f32 0.11111111, %v166_v32  ;;  %v739_v47 = vmul.f32 0.11111111, %v165_v37  ;;  %v216_v48 = vadd.f32 %v214_v33, %v638_v20  ;;  %v222_v16 = vmul.f32 %v742_v51, %v742_v51 }
  0xb7   :  { %v202_v21 = vpop.permute.xlu1 %201  ;;  %v200_v22 = vpop.permute.xlu0 %199  ;;  %v215_v52 = vadd.f32 %v213_v38, %v642_v3 }
  0xb8   :  { %v208_v25 = vmul.f32 2.0, %v202_v21  ;;  %v207_v26 = vmul.f32 2.0, %v200_v22  ;;  %v206_v39 = vadd.f32 %v204_v31, %v202_v21  ;;  %v205_v1 = vadd.f32 %v203_v49, %v200_v22 }
  0xb9   :  { %v277_v8 = vmul.f32 %v739_v47, %v739_v47 }
  0xba   :  { %v210_v34 = vadd.f32 %v208_v25, %v638_v20  ;;  %v209_v40 = vadd.f32 %v207_v26, %v642_v3  ;;  %v221_v20 = vmul.f32 %v733_v2, %v733_v2  ;;  %v278_v3 = vmul.f32 %v735_v45, %v735_v45 }
  0xbb   :  { %v254_v41 = vpop.permute.xlu1 %253  ;;  %v252_v44 = vpop.permute.xlu0 %251 }
  0xbc   :  { %v212_v46 = vsel %vm696_vm4, %v210_v34, %v206_v39  ;;  %v211_v53 = vsel %vm696_vm4, %v209_v40, %v205_v1  ;;  %v270_v54 = vmul.f32 2.0, %v254_v41  ;;  %v260_v58 = vadd.f32 %v254_v41, %v660_v29 }
  0xbd   :  { %v218_v57 = vsel %vm706_vm5, %v216_v48, %v212_v46  ;;  %v269_v59 = vmul.f32 2.0, %v252_v44  ;;  %v259_v61 = vadd.f32 %v252_v44, %v664_v30  ;;  %v217_v0 = vsel %vm706_vm5, %v215_v52, %v211_v53 }
  0xbe   :  { %v220_v9 = vmul.f32 0.11111111, %v218_v57  ;;  %v272_v11 = vadd.f32 %v270_v54, %v660_v29  ;;  %v219_v5 = vmul.f32 0.11111111, %v217_v0  ;;  %v350_v22 = vadd.f32 %v278_v3, %v222_v16 }
  0xbf   :  { %v258_v55 = vpop.permute.xlu1 %257  ;;  %v256_v56 = vpop.permute.xlu0 %255  ;;  %v271_v17 = vadd.f32 %v269_v59, %v664_v30  ;;  %v349_v24 = vadd.f32 %v277_v8, %v221_v20 }
  0xc0   :  { %v264_v60 = vmul.f32 2.0, %v258_v55  ;;  %v263_v62 = vmul.f32 2.0, %v256_v56  ;;  %v262_v6 = vadd.f32 %v260_v58, %v258_v55  ;;  %v261_v12 = vadd.f32 %v259_v61, %v256_v56 }
  0xc1   :  { %v223_v49 = vsub.f32 %v219_v5, %v221_v20  ;;  %v352_v46 = vadd.f32 0.0001, %v350_v22  ;;  %v351_v53 = vadd.f32 0.0001, %v349_v24 }
  0xc2   :  { %v266_v7 = vadd.f32 %v264_v60, %v660_v29  ;;  %v265_v13 = vadd.f32 %v263_v62, %v664_v30  ;;  %v224_v30 = vsub.f32 %v220_v9, %v222_v16  ;;  %v333_v60 = vmul.f32 %v739_v47, %v733_v2 }
  0xc3   :  { %v310_v14 = vpop.permute.xlu1 %309  ;;  %v308_v15 = vpop.permute.xlu0 %307  ;;  %v337_v62 = vmul.f32 2.0, %v733_v2 }
  0xc4   :  { %v268_v18 = vsel %vm696_vm4, %v266_v7, %v262_v6  ;;  %v316_v4 = vadd.f32 %v310_v14, %v678_v42  ;;  %v267_v29 = vsel %vm696_vm4, %v265_v13, %v261_v12  ;;  %v315_v10 = vadd.f32 %v308_v15, %v682_v43 }
  0xc5   :  { %v274_v35 = vsel %vm706_vm5, %v272_v11, %v268_v18  ;;  %v273_v23 = vsel %vm706_vm5, %v271_v17, %v267_v29  ;;  %v326_v26 = vmul.f32 2.0, %v310_v14  ;;  %v325_v31 = vmul.f32 2.0, %v308_v15 }
  0xc6   :  { %v276_v21 = vmul.f32 0.11111111, %v274_v35  ;;  %v275_v25 = vmul.f32 0.11111111, %v273_v23  ;;  %v339_v19 = vmul.f32 %v337_v62, %v739_v47 }
  0xc7   :  { %v314_v27 = vpop.permute.xlu1 %313  ;;  %v312_v28 = vpop.permute.xlu0 %311  ;;  %v328_v44 = vadd.f32 %v326_v26, %v678_v42  ;;  %v327_v48 = vadd.f32 %v325_v31, %v682_v43 }
  0xc8   :  { %v280_v36 = vsub.f32 %v276_v21, %v278_v3  ;;  %v318_v32 = vadd.f32 %v316_v4, %v314_v27  ;;  %v320_v33 = vmul.f32 2.0, %v314_v27  ;;  %v279_v34 = vsub.f32 %v275_v25, %v277_v8 }
  0xc9   :  { %v317_v37 = vadd.f32 %v315_v10, %v312_v28  ;;  %v319_v38 = vmul.f32 2.0, %v312_v28  ;;  %v338_v3 = vmul.f32 2.0, %v742_v51  ;;  %v341_v12 = vadd.f32 0.0001, %v339_v19 }
  0xca   :  { %v354_v39 = vadd.f32 %v280_v36, %v224_v30  ;;  %v322_v40 = vadd.f32 %v320_v33, %v678_v42  ;;  %v353_v41 = vadd.f32 %v279_v34, %v223_v49  ;;  %v334_v42 = vmul.f32 %v735_v45, %v742_v51 }
  0xcb   :  { %v321_v50 = vadd.f32 %v319_v38, %v682_v43  ;;  %v340_v7 = vmul.f32 %v338_v3, %v735_v45 }
  0xcc   :  { %v356_v1 = vadd.f32 0.0009, %v354_v39  ;;  %v324_v52 = vsel %vm696_vm4, %v322_v40, %v318_v32  ;;  %v355_v54 = vadd.f32 0.0009, %v353_v41 }
  0xcd   :  { %v330_v55 = vsel %vm706_vm5, %v328_v44, %v324_v52  ;;  %v323_v56 = vsel %vm696_vm4, %v321_v50, %v317_v37  ;;  %v342_v11 = vadd.f32 0.0001, %v340_v7 }
  0xce   :  { %v358_v57 = vmul.f32 %v356_v1, %v352_v46  ;;  %v332_v58 = vmul.f32 0.11111111, %v330_v55  ;;  %v329_v59 = vsel %vm706_vm5, %v327_v48, %v323_v56  ;;  %v357_v43 = vmul.f32 %v355_v54, %v351_v53 }
  0xcf   :  { %v331_v20 = vmul.f32 0.11111111, %v329_v59 }
  0xd0   :  { %398 = vrcp.f32 %v358_v57  ;;  %v336_v61 = vsub.f32 %v332_v58, %v334_v42 }
  0xd1   :  { %400 = vrcp.f32 %v357_v43  ;;  %v335_v63 = vsub.f32 %v331_v20, %v333_v60 }
  0xd2   :  { %v344_v0 = vmul.f32 2.0, %v336_v61 }
  0xd3   :  { %v343_v6 = vmul.f32 2.0, %v335_v63 }
  0xd4   :  { %v346_v8 = vadd.f32 0.0009, %v344_v0 }
  0xd5   :  { %v345_v9 = vadd.f32 0.0009, %v343_v6 }
  0xd6   :  { %v348_v13 = vmul.f32 %v346_v8, %v342_v11 }
  0xd7   :  { %v347_v15 = vmul.f32 %v345_v9, %v341_v12 }
  0xda   :  { %v399_v14 = vpop.eup %398 }
  0xdb   :  { %v401_v16 = vpop.eup %400  ;;  %v362_v17 = vmul.f32 %v399_v14, %v348_v13 }
  0xdc   :  { %v361_v51 = vmul.f32 %v401_v16, %v347_v15 }
  0xdd   :  { %v364_v18 = vsub.f32 1.0, %v362_v17 }
  0xde   :  { %v363_v4 = vsub.f32 1.0, %v361_v51 }
  0xdf   :  { %v366_v5 = vmul.f32 0.5, %v364_v18 }
  0xe0   :  { %v365_v2 = vmul.f32 0.5, %v363_v4 }
  0xe1   :  { %v368_v35 = vmax.f32 %v366_v5, 0.0 }
  0xe2   :  { %v367_v45 = vmax.f32 %v365_v2, 0.0 }
  0xe3   :  { %v370_v29 = vmin.f32 %v368_v35, 1.0 }
  0xe4   :  { %v369_v47 = vmin.f32 %v367_v45, 1.0 }
  0xe5   :  { %372 = vst [vmem:[#allocation7 + $0x8] sm:$0xff] %v370_v29 }
  0xe6   :  { %371 = vst [vmem:[#allocation7] sm:$0xff] %v369_v47 }
  0xe7   :  { %457 = shalt.err (!%p454_p6)
}
  0xe8   :  { %s458_s12 = scalar_lea.hbm %s812_s2, 256 }
  0xe9   :  { %p459_p7 = scmp.ne.s32.totalorder %s812_s2, %s458_s12  ;;  %p462_p8 = scmp.lt.u32.totalorder %s458_s12, %s812_s2 }
  0xeb   :  { %p464_p9 = pnand %p462_p8, %p459_p7 }
  0xed   :  { %467 = shalt.err (!%p464_p9)
}
  0xee   :  { %384 = dma.vmem_to_hbm [thread:$0]  %s379_s8, 256, %s812_s2, [#allocation4], %s475_s19, %s475_s19, %s476_s20  }
  0xef   :  { %472 = dma.done.wait [#allocation4], 256  }
  0xf0   :  { %473 = vsyncadd [#allocation4], 4294967040 }
  0xf1   :  { %388 = vsyncpa [#allocation3], 1 }
  0xf2   :  { %389 = vsyncpa [#allocation6], 1 }
  0xf3   :  { %390 = vsyncpa [#allocation4], 1 }

</bundles_post_ra>
